<compile_context>
chip_gen: v6e
topology: v6e:2x2x1
jax: 0.10.0
libtpu: 0.0.40
codegen_flags: <defaults>
</compile_context>

<pallas_src>
import functools

import jax
import jax.numpy as jnp
from jax import lax
from jax.experimental import pallas as pl
from jax.experimental.pallas import tpu as pltpu

EPS = 1e-5          # nn.GroupNorm default eps
LANE = 128          # TPU lane width; block last dims kept a multiple of this
_MIB = 1 << 20


# ---------------------------------------------------------------------------
# Hardware-aware budgets
# ---------------------------------------------------------------------------
def _tpu_caps():
    """Returns (default vmem budget, vmem limit cap, multicore-part hint)."""
    vmem_cap = None
    is_v7 = False
    try:
        info = pltpu.get_tpu_info()
        v = getattr(info, "vmem_capacity_bytes", None)
        if v:
            vmem_cap = int(v)
        ver = getattr(info, "chip_version", None)
        if ver is not None and "7" in str(ver):
            is_v7 = True
    except Exception:
        pass
    multicore = is_v7 or (vmem_cap is not None and vmem_cap < 100 * _MIB)
    if multicore or vmem_cap is None:
        # v7x (64 MiB VMEM / TC, 2 TCs) or unknown hardware: stay conservative.
        return 22 * _MIB, 48 * _MIB, multicore
    # v5e / v6e: 128 MiB VMEM -> keep large samples on the single-pass path.
    return 80 * _MIB, 100 * _MIB, False


def _vmem_limit(block_bytes, cap):
    return int(min(cap, max(32 * _MIB, block_bytes + 8 * _MIB)))


def _choose_tile_hw(hwp, per_lane_bytes, budget_bytes):
    """Widest lane-dense tile that fits the VMEM budget (no divisibility req)."""
    lanes_fit = max(1, int(budget_bytes // (LANE * max(1, per_lane_bytes))))
    lanes = min(lanes_fit, max(1, hwp // LANE))
    return LANE * lanes


# ---------------------------------------------------------------------------
# Kernels
# ---------------------------------------------------------------------------
def _fused_single_kernel(x_ref, wg_ref, wgs_ref, wb_ref, o_ref, *, n_valid, eps):
    """Whole sample resident in VMEM: 1x1 channel mix + stats in one pass.

    x_ref  : (1, C, HWp)   one sample, zero-padded along HW (native dtype)
    wg_ref : (Cout, C)     W * gamma[None, :]   (bf16 when x is bf16)
    wgs_ref: (Cout, 1)     W @ gamma            (f32)
    wb_ref : (Cout, 1)     W @ beta + bias      (f32)
    o_ref  : (1, Cout, HWp)

    Z = Wg @ x is independent of the statistics, so the MXU work is issued
    without waiting on the full-sample reduction; the norm is applied in a
    cheap VALU epilogue: y = inv*Z + (wb - mean*inv*wgs).
    """
    x = x_ref[0]                                   # keep native dtype for the MXU
    z = jnp.dot(wg_ref[...], x, preferred_element_type=jnp.float32)   # (Cout, HWp)

    xf = x.astype(jnp.float32)
    s = jnp.sum(xf)
    ss = jnp.sum(xf * xf)
    mean = s / n_valid
    var = jnp.maximum(ss / n_valid - mean * mean, 0.0)   # biased var, clamped
    inv = lax.rsqrt(var + eps)

    b_eff = wb_ref[...] - (mean * inv) * wgs_ref[...]    # (Cout, 1)
    o_ref[0] = (inv * z + b_eff).astype(o_ref.dtype)


def _stats_kernel(x_ref, wg_ref, wgs_ref, wb_ref, weff_ref, beff_ref, acc_ref,
                  *, n_valid, eps):
    """Tiled pass 1: accumulate per-sample sum / sum-of-squares in SMEM, then
    emit the folded per-sample weight (inv*Wg) and bias on the last tile."""
    t = pl.program_id(1)

    @pl.when(t == 0)
    def _():
        acc_ref[0] = jnp.float32(0.0)
        acc_ref[1] = jnp.float32(0.0)

    xf = x_ref[0].astype(jnp.float32)
    acc_ref[0] += jnp.sum(xf)
    acc_ref[1] += jnp.sum(xf * xf)

    @pl.when(t == pl.num_programs(1) - 1)
    def _():
        mean = acc_ref[0] / n_valid
        var = jnp.maximum(acc_ref[1] / n_valid - mean * mean, 0.0)
        inv = lax.rsqrt(var + eps)
        weff_ref[0] = (wg_ref[...].astype(jnp.float32) * inv).astype(weff_ref.dtype)
        beff_ref[0] = wb_ref[...] - (mean * inv) * wgs_ref[...]


def _apply_kernel(x_ref, weff_ref, beff_ref, o_ref):
    """Tiled pass 2: out_tile = W_eff[b] @ x_tile + b_eff[b] (norm fully folded).

    x stays in its native dtype (bf16 x bf16 -> f32 on the MXU when applicable).
    """
    y = jnp.dot(weff_ref[0], x_ref[0], preferred_element_type=jnp.float32)
    o_ref[0] = (y + beff_ref[0]).astype(o_ref.dtype)


# ---------------------------------------------------------------------------
# Wrappers
# ---------------------------------------------------------------------------
def fused_groupnorm_pointwise(x, gamma, beta, w, b=None, *, eps=EPS,
                              vmem_budget_bytes=None,
                              force_tiled=False, tile_hw=None):
    """GroupNorm(num_groups=1) over (C, H, W) fused with a pointwise channel mix:
        out = W @ groupnorm(x) + b   (per spatial location)

    x: (B, C, H, W); gamma, beta: (C,); w: (Cout, C); b: (Cout,) or None.
    Returns (B, Cout, H, W) in x.dtype.
    """
    B, C, H, W_ = x.shape
    Cout = w.shape[0]
    HW = H * W_
    HWp = -(-HW // LANE) * LANE                   # pad to lane-dense width

    budget_default, limit_cap, multicore = _tpu_caps()
    budget = budget_default if vmem_budget_bytes is None else int(vmem_budget_bytes)

    x3 = x.reshape(B, C, HW)
    out_dtype = x.dtype
    mm_dtype = jnp.bfloat16 if x.dtype == jnp.bfloat16 else jnp.float32

    # Fold gamma/beta (and the conv bias) into the 1x1 weights once, host side.
    wf = w.astype(jnp.float32)
    g = gamma.astype(jnp.float32)
    bt = beta.astype(jnp.float32)
    wg = (wf * g[None, :]).astype(mm_dtype)       # (Cout, C)
    wgs = (wf @ g).reshape(Cout, 1)               # (Cout, 1) f32
    wb = (wf @ bt).reshape(Cout, 1)               # (Cout, 1) f32
    if b is not None:
        wb = wb + b.astype(jnp.float32).reshape(Cout, 1)

    n_valid = float(C * HW)                       # stats ignore the zero padding
    in_b = x3.dtype.itemsize
    out_b = jnp.dtype(out_dtype).itemsize
    # bytes of double-buffered I/O blocks + f32 temporaries, per lane of HW
    per_lane = 2 * (C * in_b + Cout * out_b) + (C + Cout) * 4

    # On multi-TensorCore parts (v7x), a single sample on the single-pass path
    # would use only one core; prefer the tiled path so pass 2 is fully parallel.
    multicore_split = multicore and B == 1 and C * HW * in_b >= 4 * _MIB

    use_tiled = (force_tiled or tile_hw is not None
                 or per_lane * HWp > budget or multicore_split)

    def _pad_to(arr, width):
        if arr.shape[-1] == width:
            return arr
        return jnp.pad(arr, ((0, 0), (0, 0), (0, width - arr.shape[-1])))

    if not use_tiled:
        Wp = HWp
        xp = _pad_to(x3, Wp)
        kern = functools.partial(_fused_single_kernel, n_valid=n_valid, eps=eps)
        out3 = pl.pallas_call(
            kern,
            out_shape=jax.ShapeDtypeStruct((B, Cout, Wp), out_dtype),
            grid_spec=pltpu.PrefetchScalarGridSpec(
                num_scalar_prefetch=0,
                grid=(B,),
                in_specs=[
                    pl.BlockSpec((1, C, Wp), lambda i: (i, 0, 0)),
                    pl.BlockSpec((Cout, C), lambda i: (0, 0)),
                    pl.BlockSpec((Cout, 1), lambda i: (0, 0)),
                    pl.BlockSpec((Cout, 1), lambda i: (0, 0)),
                ],
                out_specs=pl.BlockSpec((1, Cout, Wp), lambda i: (i, 0, 0)),
            ),
            compiler_params=pltpu.CompilerParams(
                dimension_semantics=("parallel",),
                vmem_limit_bytes=_vmem_limit(per_lane * Wp, limit_cap),
            ),
            cost_estimate=pl.CostEstimate(
                flops=int(B * Wp * (2 * Cout * C + 3 * C + 2 * Cout)),
                transcendentals=int(B),
                bytes_accessed=int(B * Wp * (C * in_b + Cout * out_b)),
            ),
        )(xp, wg, wgs, wb)
    else:
        if tile_hw is None:
            tile_hw = _choose_tile_hw(HWp, per_lane, budget)
        tile_hw = max(LANE, (int(tile_hw) // LANE) * LANE)
        if multicore_split:
            # make sure there are >= 2 tiles so both TensorCores get work
            half = -(-(HWp // LANE) // 2) * LANE
            tile_hw = min(tile_hw, max(LANE, half))
        Wp = -(-HWp // tile_hw) * tile_hw         # pad HW up to a tile multiple
        T = Wp // tile_hw
        xp = _pad_to(x3, Wp)
        limit = _vmem_limit(per_lane * tile_hw, limit_cap)

        # pass 1: per-sample statistics -> folded per-sample weight / bias
        stats_kern = functools.partial(_stats_kernel, n_valid=n_valid, eps=eps)
        weff, beff = pl.pallas_call(
            stats_kern,
            out_shape=(jax.ShapeDtypeStruct((B, Cout, C), mm_dtype),
                       jax.ShapeDtypeStruct((B, Cout, 1), jnp.float32)),
            grid_spec=pltpu.PrefetchScalarGridSpec(
                num_scalar_prefetch=0,
                grid=(B, T),
                in_specs=[
                    pl.BlockSpec((1, C, tile_hw), lambda i, t: (i, 0, t)),
                    pl.BlockSpec((Cout, C), lambda i, t: (0, 0)),
                    pl.BlockSpec((Cout, 1), lambda i, t: (0, 0)),
                    pl.BlockSpec((Cout, 1), lambda i, t: (0, 0)),
                ],
                out_specs=[
                    pl.BlockSpec((1, Cout, C), lambda i, t: (i, 0, 0)),
                    pl.BlockSpec((1, Cout, 1), lambda i, t: (i, 0, 0)),
                ],
                scratch_shapes=[pltpu.SMEM((2,), jnp.float32)],
            ),
            compiler_params=pltpu.CompilerParams(
                dimension_semantics=("parallel", "arbitrary"),
                vmem_limit_bytes=limit,
            ),
            cost_estimate=pl.CostEstimate(
                flops=int(3 * B * C * Wp),
                transcendentals=int(B),
                bytes_accessed=int(B * C * Wp * in_b),
            ),
        )(xp, wg, wgs, wb)

        # pass 2: lane-dense fused matmul + bias; both grid axes parallel
        out3 = pl.pallas_call(
            _apply_kernel,
            out_shape=jax.ShapeDtypeStruct((B, Cout, Wp), out_dtype),
            grid_spec=pltpu.PrefetchScalarGridSpec(
                num_scalar_prefetch=0,
                grid=(B, T),
                in_specs=[
                    pl.BlockSpec((1, C, tile_hw), lambda i, t: (i, 0, t)),
                    pl.BlockSpec((1, Cout, C), lambda i, t: (i, 0, 0)),
                    pl.BlockSpec((1, Cout, 1), lambda i, t: (i, 0, 0)),
                ],
                out_specs=pl.BlockSpec((1, Cout, tile_hw), lambda i, t: (i, 0, t)),
            ),
            compiler_params=pltpu.CompilerParams(
                dimension_semantics=("parallel", "parallel"),
                vmem_limit_bytes=limit,
            ),
            cost_estimate=pl.CostEstimate(
                flops=int(2 * B * Cout * C * Wp),
                transcendentals=0,
                bytes_accessed=int(B * Wp * (C * in_b + Cout * out_b)),
            ),
        )(xp, weff, beff)

    if out3.shape[-1] != HW:
        out3 = out3[:, :, :HW]
    return out3.reshape(B, Cout, H, W_)


def groupnorm1(x, gamma, beta, **kwargs):
    """Plain GroupNorm(num_groups=1, num_channels=C): identity channel mix."""
    C = x.shape[1]
    eye = jnp.eye(C, dtype=jnp.float32)
    return fused_groupnorm_pointwise(x, gamma, beta, eye, None, **kwargs)


class PreNorm:
    """JAX/Pallas PreNorm(dim, fn): GroupNorm(1, dim) followed by fn.

    If fn's leading op is a pointwise 1x1 conv (as for every PreNorm-wrapped
    Attention/LinearAttention in the Unet, whose first op is `to_qkv`), pass
    its (weight, bias) via pointwise_w / pointwise_b: the norm and the 1x1 conv
    are fused into one Pallas kernel and `rest_fn` runs on the result as glue.
    Without pointwise weights it falls back to the Pallas GroupNorm + fn(x).
    """

    def __init__(self, dim, fn=None, *, pointwise_w=None, pointwise_b=None,
                 rest_fn=None):
        self.fn = fn
        self.pointwise_w = pointwise_w
        self.pointwise_b = pointwise_b
        self.rest_fn = rest_fn
        # nn.GroupNorm(1, dim) init: weight = ones, bias = zeros
        self.gamma = jnp.ones((dim,), jnp.float32)
        self.beta = jnp.zeros((dim,), jnp.float32)

    def __call__(self, x, **kwargs):
        if self.pointwise_w is not None:
            y = fused_groupnorm_pointwise(x, self.gamma, self.beta,
                                          self.pointwise_w, self.pointwise_b,
                                          **kwargs)
            return self.rest_fn(y) if self.rest_fn is not None else y
        y = groupnorm1(x, self.gamma, self.beta, **kwargs)
        return self.fn(y) if self.fn is not None else y


# ---------------------------------------------------------------------------
# Self-test
# ---------------------------------------------------------------------------
def _reference(x, gamma, beta, w, b):
    """Pure-JAX reference: GroupNorm(1, C) then 1x1 conv."""
    B, C, H, W_ = x.shape
    xf = x.astype(jnp.float32)
    xm = xf.reshape(B, -1)
    mean = xm.mean(axis=1).reshape(B, 1, 1, 1)
    var = xm.var(axis=1).reshape(B, 1, 1, 1)      # biased, like PyTorch GroupNorm
    y = (xf - mean) / jnp.sqrt(var + EPS)
    y = y * gamma.reshape(1, C, 1, 1) + beta.reshape(1, C, 1, 1)
    out = jnp.einsum('oc,bchw->bohw', w.astype(jnp.float32), y)
    if b is not None:
        out = out + b.astype(jnp.float32).reshape(1, -1, 1, 1)
    return out


if __name__ == "__main__":
    key = jax.random.PRNGKey(0)
    B, C, Cout, H, W = 2, 8, 16, 16, 16
    kx, kw, kb, kg, kbe, kx2, kx3 = jax.random.split(key, 7)

    x = jax.random.normal(kx, (B, C, H, W), dtype=jnp.float32)
    w_1x1 = 0.1 * jax.random.normal(kw, (Cout, C), dtype=jnp.float32)
    b_1x1 = 0.1 * jax.random.normal(kb, (Cout,), dtype=jnp.float32)
    gamma = 1.0 + 0.1 * jax.random.normal(kg, (C,), dtype=jnp.float32)
    beta = 0.1 * jax.random.normal(kbe, (C,), dtype=jnp.float32)

    ref = _reference(x, gamma, beta, w_1x1, b_1x1)

    # 1) fully fused single-block path (1 HBM read + 1 write per sample)
    out1 = jax.block_until_ready(
        fused_groupnorm_pointwise(x, gamma, beta, w_1x1, b_1x1))
    assert out1.shape == (B, Cout, H, W)
    assert float(jnp.max(jnp.abs(out1 - ref))) < 1e-4, "fused single-block mismatch"

    # 2) tiled two-pass path, tile divides padded HW (HWp=256 -> 2x128)
    out2 = jax.block_until_ready(
        fused_groupnorm_pointwise(x, gamma, beta, w_1x1, b_1x1,
                                  force_tiled=True, tile_hw=128))
    assert float(jnp.max(jnp.abs(out2 - ref))) < 1e-4, "fused tiled mismatch"

    # 3) tiled two-pass with a tile that does NOT divide HWp
    #    (24x24 -> HWp=640, tile 256 -> padded to 768, T=3, masked remainder)
    x_big = jax.random.normal(kx3, (B, C, 24, 24), dtype=jnp.float32)
    ref_big = _reference(x_big, gamma, beta, w_1x1, b_1x1)
    out3 = jax.block_until_ready(
        fused_groupnorm_pointwise(x_big, gamma, beta, w_1x1, b_1x1,
                                  force_tiled=True, tile_hw=256))
    assert float(jnp.max(jnp.abs(out3 - ref_big))) < 1e-4, "non-divisible-tile mismatch"

    # 4) non-multiple-of-128 spatial size (10x10 -> padded to 128 lanes)
    x_odd = jax.random.normal(kx2, (B, C, 10, 10), dtype=jnp.float32)
    pre_fused = PreNorm(C, pointwise_w=w_1x1, pointwise_b=b_1x1)
    out4 = jax.block_until_ready(pre_fused(x_odd))
    ref4 = _reference(x_odd, jnp.ones((C,), jnp.float32),
                      jnp.zeros((C,), jnp.float32), w_1x1, b_1x1)
    assert out4.shape == (B, Cout, 10, 10)
    assert float(jnp.max(jnp.abs(out4 - ref4))) < 1e-4, "padded-HW mismatch"

    # 5) bf16 activations: bf16 x bf16 MXU path (single-pass and tiled)
    xb = x.astype(jnp.bfloat16)
    refb = _reference(xb, gamma, beta, w_1x1, b_1x1)
    outb1 = jax.block_until_ready(
        fused_groupnorm_pointwise(xb, gamma, beta, w_1x1, b_1x1))
    assert outb1.dtype == jnp.bfloat16
    assert float(jnp.max(jnp.abs(outb1.astype(jnp.float32) - refb))) < 5e-2, \
        "bf16 single-block mismatch"
    outb2 = jax.block_until_ready(
        fused_groupnorm_pointwise(xb, gamma, beta, w_1x1, b_1x1,
                                  force_tiled=True, tile_hw=128))
    assert float(jnp.max(jnp.abs(outb2.astype(jnp.float32) - refb))) < 5e-2, \
        "bf16 tiled mismatch"

    # 6) generic PreNorm(dim, fn): Pallas GroupNorm, fn as plain-JAX glue
    def fn(y):
        return jnp.einsum('oc,bchw->bohw', w_1x1, y)

    pre_plain = PreNorm(C, fn)
    out6 = jax.block_until_ready(pre_plain(x))
    ref6 = _reference(x, jnp.ones((C,), jnp.float32),
                      jnp.zeros((C,), jnp.float32), w_1x1, None)
    assert float(jnp.max(jnp.abs(out6 - ref6))) < 1e-4, "groupnorm-only mismatch"

    print("KERNEL_OK")
</pallas_src>

<mosaic_0001>
module attributes {stable_mosaic.version = 11 : i64} {
  func.func @_fused_single_kernel(%arg0: i32, %arg1: memref<1x8x256xf32, #tpu.memory_space<vmem>>, %arg2: memref<16x8xf32, #tpu.memory_space<vmem>>, %arg3: memref<16x1xf32, #tpu.memory_space<vmem>>, %arg4: memref<16x1xf32, #tpu.memory_space<vmem>>, %arg5: memref<1x16x256xf32, #tpu.memory_space<vmem>>) attributes {dimension_semantics = [#tpu.dimension_semantics<parallel>], iteration_bounds = array<i64: 2>, scalar_prefetch = 0 : i64, scratch_operands = 0 : i64, tpu.core_type = #tpu.core_type<tc>, window_params = [{transform_indices = @transform_0, window_bounds = array<i64: 1, 8, 256>}, {pipeline_mode = #tpu.pipeline_mode<synchronous>, transform_indices = @transform_1, window_bounds = array<i64: 16, 8>}, {pipeline_mode = #tpu.pipeline_mode<synchronous>, transform_indices = @transform_2, window_bounds = array<i64: 16, 1>}, {pipeline_mode = #tpu.pipeline_mode<synchronous>, transform_indices = @transform_3, window_bounds = array<i64: 16, 1>}, {transform_indices = @transform_4, window_bounds = array<i64: 1, 16, 256>}]} {
    %c0 = arith.constant 0 : index
    %c0_0 = arith.constant 0 : index
    %c0_1 = arith.constant 0 : index
    %0 = vector.load %arg1[%c0, %c0_0, %c0_1] : memref<1x8x256xf32, #tpu.memory_space<vmem>>, vector<1x8x256xf32>
    %1 = vector.shape_cast %0 : vector<1x8x256xf32> to vector<8x256xf32>
    %c0_2 = arith.constant 0 : index
    %c0_3 = arith.constant 0 : index
    %2 = vector.load %arg2[%c0_2, %c0_3] : memref<16x8xf32, #tpu.memory_space<vmem>>, vector<16x8xf32>
    %cst = arith.constant dense<0.000000e+00> : vector<16x256xf32>
    %3 = tpu.matmul %2, %1, %cst {dimension_numbers = #tpu.dot_dimension_numbers<[1], [0], [0], [1], [0, 0, 1, 1], [], []>} : vector<16x8xf32>, vector<8x256xf32>, vector<16x256xf32> -> vector<16x256xf32>
    %4 = vector.shape_cast %1 : vector<8x256xf32> to vector<1x8x256xf32>
    %cst_4 = arith.constant dense<0.000000e+00> : vector<1xf32>
    %5 = vector.multi_reduction <add>, %4, %cst_4 [1, 2] : vector<1x8x256xf32> to vector<1xf32>
    %6 = vector.shape_cast %5 : vector<1xf32> to vector<1x1x1xf32>
    %7 = vector.extract %6[0, 0, 0] : f32 from vector<1x1x1xf32>
    %8 = arith.mulf %1, %1 : vector<8x256xf32>
    %9 = vector.shape_cast %8 : vector<8x256xf32> to vector<1x8x256xf32>
    %cst_5 = arith.constant dense<0.000000e+00> : vector<1xf32>
    %10 = vector.multi_reduction <add>, %9, %cst_5 [1, 2] : vector<1x8x256xf32> to vector<1xf32>
    %11 = vector.shape_cast %10 : vector<1xf32> to vector<1x1x1xf32>
    %12 = vector.extract %11[0, 0, 0] : f32 from vector<1x1x1xf32>
    %cst_6 = arith.constant 2.048000e+03 : f32
    %13 = arith.divf %7, %cst_6 : f32
    %cst_7 = arith.constant 2.048000e+03 : f32
    %14 = arith.divf %12, %cst_7 : f32
    %15 = arith.mulf %13, %13 : f32
    %16 = arith.subf %14, %15 : f32
    %cst_8 = arith.constant 0.000000e+00 : f32
    %17 = arith.maximumf %16, %cst_8 : f32
    %cst_9 = arith.constant 9.99999974E-6 : f32
    %18 = arith.addf %17, %cst_9 : f32
    %19 = math.rsqrt %18 : f32
    %c0_10 = arith.constant 0 : index
    %c0_11 = arith.constant 0 : index
    %20 = vector.load %arg4[%c0_10, %c0_11] : memref<16x1xf32, #tpu.memory_space<vmem>>, vector<16x1xf32>
    %21 = arith.mulf %13, %19 : f32
    %c0_12 = arith.constant 0 : index
    %c0_13 = arith.constant 0 : index
    %22 = vector.load %arg3[%c0_12, %c0_13] : memref<16x1xf32, #tpu.memory_space<vmem>>, vector<16x1xf32>
    %23 = vector.broadcast %21 : f32 to vector<16x1xf32>
    %24 = arith.mulf %23, %22 : vector<16x1xf32>
    %25 = arith.subf %20, %24 : vector<16x1xf32>
    %26 = vector.broadcast %19 : f32 to vector<16x256xf32>
    %27 = arith.mulf %26, %3 : vector<16x256xf32>
    %28 = vector.broadcast %25 : vector<16x1xf32> to vector<16x256xf32>
    %29 = arith.addf %27, %28 : vector<16x256xf32>
    %c0_14 = arith.constant 0 : index
    %c0_15 = arith.constant 0 : index
    %c0_16 = arith.constant 0 : index
    %30 = vector.load %arg5[%c0_14, %c0_15, %c0_16] : memref<1x16x256xf32, #tpu.memory_space<vmem>>, vector<1x16x256xf32>
    %31 = vector.shape_cast %30 : vector<1x16x256xf32> to vector<16x256xf32>
    %32 = vector.shape_cast %29 : vector<16x256xf32> to vector<1x16x256xf32>
    tpu.vector_store %arg5[%c0_14, %c0_15, %c0_16], %32 {strides = array<i32>} : memref<1x16x256xf32, #tpu.memory_space<vmem>>, vector<1x16x256xf32>,
    return
  }
  func.func @transform_0(%arg0: i32) -> (i32, i32, i32) {
    %c0_i32 = arith.constant 0 : i32
    %c0_i32_0 = arith.constant 0 : i32
    %c0_i32_1 = arith.constant 0 : i32
    return %arg0, %c0_i32, %c0_i32_0 : i32, i32, i32
  }
  func.func @transform_1(%arg0: i32) -> (i32, i32) {
    %c0_i32 = arith.constant 0 : i32
    %c0_i32_0 = arith.constant 0 : i32
    %c0_i32_1 = arith.constant 0 : i32
    return %c0_i32, %c0_i32_0 : i32, i32
  }
  func.func @transform_2(%arg0: i32) -> (i32, i32) {
    %c0_i32 = arith.constant 0 : i32
    %c0_i32_0 = arith.constant 0 : i32
    %c0_i32_1 = arith.constant 0 : i32
    return %c0_i32, %c0_i32_0 : i32, i32
  }
  func.func @transform_3(%arg0: i32) -> (i32, i32) {
    %c0_i32 = arith.constant 0 : i32
    %c0_i32_0 = arith.constant 0 : i32
    %c0_i32_1 = arith.constant 0 : i32
    return %c0_i32, %c0_i32_0 : i32, i32
  }
  func.func @transform_4(%arg0: i32) -> (i32, i32, i32) {
    %c0_i32 = arith.constant 0 : i32
    %c0_i32_0 = arith.constant 0 : i32
    %c0_i32_1 = arith.constant 0 : i32
    return %arg0, %c0_i32, %c0_i32_0 : i32, i32, i32
  }
}

</mosaic_0001>

<bundles_post_ra>
// kernel: tpu_custom_call.1
= control target key start
LH: loop header
LB: loop body
LE: loop exit
PB: predicated region body
PF: predicated region fallthrough
CT: control target
= control target key end

     0   :  { %9 = vsyncpa [#allocation3], 0  ;;  %s713_s0 = inlined_call_operand.vmem [shape: f32[2,8,256], index: 0, kind: input, shape index: {}]   ;;  %s714_s1 = inlined_call_operand.vmem [shape: f32[16,8], index: 1, kind: input, shape index: {}]   ;;  %s715_s2 = inlined_call_operand.vmem [shape: f32[16,1], index: 2, kind: input, shape index: {}]   ;;  %s716_s3 = inlined_call_operand.vmem [shape: f32[16,1], index: 3, kind: input, shape index: {}]   ;;  %s717_s4 = inlined_call_operand.hbm [shape: f32[2,16,256], index: 4, kind: output, shape index: {}]  }
   0x1   :  { %11 = vsyncpa [#allocation3 + $0x1], 0  ;;  %s593_s15 = smov 0   ;;  %s595_s16 = smov 0  }
   0x2   :  { %s597_s17 = smov 0   ;;  %s599_s18 = smov 0  }
   0x3 LB: > { %s614_s19 = sadd.s32 4294967295, %s560_s18   ;;  %s428_s20 = sadd.s32 4294967294, %s560_s18   ;;  %s560_s18 = sphi %s599_s18, %s723_s18   ;;  %s556_s17 = sphi %s597_s17, %s722_s17   ;;  %s552_s16 = sphi %s595_s16, %s721_s16   ;;  %s548_s15 = sphi %s593_s15, %s720_s15  }
   0x4   : > { %s618_s21 = sadd.s32 1, %s560_s18   ;;  %s113_s22 = sadd.s32 1, %s556_s17 }
   0x5   : > { %s110_s23 = ssub.s32 %s560_s18, %s618_s21  ;;  %p123_p0 = scmp.ne.s32.totalorder %s556_s17, %s552_s16 }
   0x6   : > { %p111_p1 = scmp.eq.s32.totalorder %s110_s23, 0  ;;  %p124_p2 = scmp.eq.s32.totalorder %s614_s19, 1 }
   0x7   : > { %p129_p3 = scmp.ne.s32.totalorder %s552_s16, %s548_s15  ;;  %p130_p4 = scmp.eq.s32.totalorder %s428_s20, 1 }
   0x8   : > { %s629_s24 = scalar_select %p111_p1, %s556_s17, %s113_s22  }
   0x9   : > { %p631_p5 = por %p124_p2, %p123_p0  ;;  %p635_p6 = por %p130_p4, %p129_p3 }
   0xa   : > { %p431_p7 = scmp.ge.s32.totalorder %s560_s18, 1  ;;  %p165_p8 = scmp.lt.s32.totalorder %s560_s18, 3 }
   0xc   : > { %p166_p9 = pnand %p431_p7, %p165_p8 }
   0xd   : > { %p191_p10 = scmp.lt.s32.totalorder (!%p166_p9), %s614_s19, 1  ;;  %s564_s22 = smov (!%p166_p9), 0.0  }
   0xe   : > { %169 = sbr.rel (%p166_p9) target bundleno = 453 (0x1c5), region = 36  ;;  %s565_s30 = smov (!%p166_p9), [#allocation2]  }
  0x13   : > { %v562_v0 = vmov 0.0   ;;  %s192_s27 = scalar_select %p191_p10, %s614_s19, 1  ;;  %v198_v3 = vld [vmem:[%s714_s1] sm:$0xff]  ;;  %vm200_vm0 = vcmask 64512   ;;  %v199_v7 = vld [vmem:[%s714_s1 + $0x8] sm:$0xff]  ;;  %v563_v23 = vmov 0  }
  0x14   : > { %271 = vmatprep.mubr.f32.mxu0 %v562_v0  ;;  %277 = vmatprep.mubr.f32.mxu1 %v562_v0  ;;  %v322_v26 = vld [vmem:[%s715_s2] sm:$0xff]  ;;  %v323_v27 = vld [vmem:[%s715_s2 + $0x8] sm:$0xff] }
  0x15   : > { %s442_s28 = sshll.u32 %s192_s27, 4  ;;  %496 = vset.pattern.permute.xlu1 %v563_v23  ;;  %497 = vset.pattern.permute.xlu0 %v563_v23  ;;  %v319_v29 = vld [vmem:[%s716_s3] sm:$0xff]  ;;  %v320_v33 = vld [vmem:[%s716_s3 + $0x8] sm:$0xff] }
  0x16   : > { %s195_s5 = scalar_lea.vmem %s713_s0, %s442_s28 }
  0x17   : > { %v196_v1 = vld [vmem:[%s195_s5] sm:$0xff]  ;;  %v197_v2 = vld [vmem:[%s195_s5 + $0x8] sm:$0xff]  ;;  %s504_s5 = sshll.u32 %s565_s30, 4  ;;  %s505_s5 = int_to_ptr.vmem [resolvable:$false] %s504_s5 }
  0x18   : > { %v284_v4 = vadd.f32 %v197_v2, %v196_v1  ;;  %v294_v5 = vmul.f32 %v196_v1, %v196_v1  ;;  %v295_v6 = vmul.f32 %v197_v2, %v197_v2  ;;  %237 = vmatprep.subr.mxu0 %v197_v2  ;;  %444 = vmatprep.subr.mxu1 %v197_v2  ;;  %s506_s6 = scalar_lea.vmem %s505_s5, 1024 }
  0x19   : > { %238 = vmatpush1.msra.mxu0 %v196_v1  ;;  %445 = vmatpush1.msra.mxu1 %v196_v1 }
  0x1a   : > { %285 = vadd.xlane.f32.xlu0 %v284_v4  ;;  %v296_v8 = vadd.f32 %v295_v6, %v294_v5  ;;  %435 = vmatmul.mubr.msk.f32.vlgmr.msra.gmra.mxu0 %vm200_vm0, %v198_v3 }
  0x1b   : > { %436 = vmatmul.mubr.msk.f32.vlgmr.msra.gmra.mxu1 %vm200_vm0, %v199_v7 }
  0x1e   : > { %297 = vadd.xlane.f32.xlu0 %v296_v8 }
  0xa3   : > { %v286_v9 = vpop.xlane.xlu0 %285 }
  0xa4   : > { %v287_v10 = vrot.slane %v286_v9, 4 }
  0xa6   : > { %v288_v11 = vadd.f32 %v287_v10, %v286_v9 }
  0xa7   : > { %v298_v12 = vpop.xlane.xlu0 %297 }
  0xa8   : > { %v289_v13 = vrot.slane %v288_v11, 2  ;;  %v299_v14 = vrot.slane %v298_v12, 4 }
  0xaa   : > { %v300_v15 = vadd.f32 %v299_v14, %v298_v12  ;;  %v290_v16 = vadd.f32 %v289_v13, %v288_v11 }
  0xac   : > { %v301_v17 = vrot.slane %v300_v15, 2  ;;  %v291_v18 = vrot.slane %v290_v16, 1 }
  0xae   : > { %v302_v19 = vadd.f32 %v301_v17, %v300_v15  ;;  %v292_v20 = vadd.f32 %v291_v18, %v290_v16 }
  0xb0   : > { %446 = vpush %v292_v20  ;;  %v303_v21 = vrot.slane %v302_v19, 1 }
  0xb2   : > { %v304_v22 = vadd.f32 %v303_v21, %v302_v19 }
  0xb4   : > { %448 = vpush %v304_v22 }
  0xda   : > { %v273_v35 = vpop.f32.mrf.mxu0 }
  0xdb   : > { %v279_v36 = vpop.f32.mrf.mxu1 }
  0xdc   : > { %v275_v38 = vpop.f32.mrf.mxu0 }
  0xdd   : > { %v281_v41 = vpop.f32.mrf.mxu1 }
  0xe1   : > { %s447_s10 = spop %446 }
  0xe2   : > { %s308_s11 = smul.f32 0.00048828125, %s447_s10 }
  0xe4   : > { %s312_s12 = smul.f32 %s308_s11, %s308_s11 }
  0xe5   : > { %s449_s13 = spop %448 }
  0xe6   : > { %s311_s14 = smul.f32 0.00048828125, %s449_s13 }
  0xe8   : > { %s313_s20 = ssub.f32 %s311_s14, %s312_s12 }
  0xea   : > { %s314_s23 = smax.f32 %s564_s22, %s313_s20  ;;  %s443_s22 = sshll.u32 %s614_s19, 9 }
  0xeb   : > { %s315_s27 = sadd.f32 1e-05, %s314_s23 }
  0xed   : > { %v316_v24 = vstv %s315_s27 }
  0xee   : > { %498 = vrsqrt.f32 %v316_v24 }
  0xfb   : > { %v499_v25 = vpop.eup %498 }
  0xfc   : > { %450 = vpush %v499_v25 }
 0x12d   : > { %s451_s28 = spop %450 }
 0x12e   : > { %s321_s29 = smul.f32 %s451_s28, %s308_s11  ;;  %s188_s11 = sand.u32 1, %s552_s16   ;;  %v329_v37 = vstv %s451_s28 }
 0x12f   : > { %s432_s13 = sshll.u32 %s188_s11, 5  ;;  %v331_v39 = vmul.f32 %v329_v37, %v275_v38  ;;  %v330_v40 = vmul.f32 %v329_v37, %v273_v35  ;;  %v333_v45 = vmul.f32 %v329_v37, %v281_v41  ;;  %v332_v46 = vmul.f32 %v329_v37, %v279_v36  ;;  %s671_s28 = scalar_lea.hbm %s717_s4, %s443_s22 }
 0x130   : > { %v324_v28 = vstv %s321_s29  ;;  %s190_s14 = scalar_lea.vmem [#allocation2], %s432_s13  ;;  %s673_s19 = scalar_lea.sflag [#allocation3], %s188_s11 }
 0x131   : > { %v325_v30 = vmul.f32 %v324_v28, %v322_v26  ;;  %v326_v31 = vmul.f32 %v324_v28, %v323_v27  ;;  %s366_s20 = sshll.u32 %s190_s14, 4  ;;  %s666_s20 = int_to_ptr.vmem [resolvable:$true] %s366_s20 }
 0x132   : > { %s500_s29 = scalar_lea.vmem %s666_s20, 512  ;;  %p507_p0 = scmp.lt.s32.totalorder %s666_s20, %s505_s5 }
 0x133   : > { %v327_v32 = vsub.f32 %v319_v29, %v325_v30  ;;  %v328_v34 = vsub.f32 %v320_v33, %v326_v31  ;;  %p501_p11 = scmp.ne.s32.totalorder %s666_s20, %s500_s29  ;;  %p508_p1 = scmp.lt.s32.totalorder %s506_s6, %s500_s29 }
 0x135   : > { %336 = vperm.xlu1 %496, %v327_v32   ;;  %p502_p12 = pnand %p501_p11, %p631_p5  ;;  %p509_p2 = por %p508_p1, %p507_p0 }
 0x137   : > { %p503_p13 = pneg %p502_p12 }
 0x139   : > { %341 = vperm.xlu1 %496, %v328_v34   ;;  %p510_p3 = pnand %p509_p2, %p503_p13 }
 0x1b0   : > { %v337_v42 = vpop.permute.xlu1 %336 }
 0x1b1   : > { %v344_v43 = vadd.f32 %v337_v42, %v330_v40  ;;  %v345_v44 = vadd.f32 %v337_v42, %v331_v39 }
 0x1b3   : > { %348 = vst [vmem:[%s190_s14] sm:$0xff] %v344_v43  ;;  %349 = vst [vmem:[%s190_s14 + $0x8] sm:$0xff] %v345_v44 }
 0x1b4   : > { %v342_v47 = vpop.permute.xlu1 %341 }
 0x1b5   : > { %v346_v48 = vadd.f32 %v342_v47, %v332_v46  ;;  %v347_v49 = vadd.f32 %v342_v47, %v333_v45 }
 0x1b7   : > { %350 = vst [vmem:[%s190_s14 + $0x10] sm:$0xff] %v346_v48  ;;  %351 = vst [vmem:[%s190_s14 + $0x18] sm:$0xff] %v347_v49 }
 0x1b8   : > { %513 = shalt.err (!%p510_p3)
}
 0x1b9   : > { %s514_s7 = scalar_lea.hbm %s671_s28, 512  ;;  %s518_s10 = scalar_lea.hbm %s717_s4, 1024 }
 0x1ba   : > { %p515_p4 = scmp.ne.s32.totalorder %s671_s28, %s514_s7  ;;  %p519_p9 = scmp.lt.s32.totalorder %s671_s28, %s717_s4 }
 0x1bb   : > { %p520_p10 = scmp.lt.s32.totalorder %s518_s10, %s514_s7 }
 0x1bc   : > { %p516_p7 = pnand %p515_p4, %p631_p5 }
 0x1bd   : > { %p521_p11 = por %p520_p10, %p519_p9 }
 0x1be   : > { %p517_p8 = pneg %p516_p7 }
 0x1c0   : > { %p522_p12 = pnand %p521_p11, %p517_p8 }
 0x1c2   : > { %525 = shalt.err (!%p522_p12)
}
 0x1c3   : > { %s566_s13 = smov 256   ;;  %s567_s14 = smov 16  }
 0x1c4   : > { %452 = dma.vmem_to_hbm [thread:$0]  (%p631_p5), %s666_s20, 512, %s671_s28, %s673_s19, %s566_s13, %s566_s13, %s567_s14  }
 0x1c5 PF: > { %p458_p13 = scmp.ge.s32.totalorder %s560_s18, 2  ;;  %s381_s22 = sand.u32 1, %s548_s15  }
 0x1c6   : > { %s382_s23 = scalar_lea.sflag [#allocation3], %s381_s22 }
 0x1c7   : > { %p455_p0 = pnand %p458_p13, %p635_p6 }
 0x1c9   : > { %p456_p1 = pneg %p455_p0 }
 0x1cb   : > { %543 = dma.done.wait (%p456_p1), %s382_s23, 512  }
 0x1cc   : > { %545 = vsyncadd (%p456_p1), %s382_s23, 4294966784  ;;  %p14_p2 = scmp.ge.s32.totalorder %s618_s21, 4   ;;  %s720_s15 = smov %s552_s16 }
 0x1cd   : > { %s721_s16 = smov %s556_s17  ;;  %s722_s17 = smov %s629_s24 }
 0x1ce   : > { %s723_s18 = smov %s618_s21  ;;  %16 = sbr.rel (!%p14_p2) target bundleno = 3 (0x3), region = 71 }
 0x1d3   :  { %387 = vsyncpa [#allocation3], 1 }
 0x1d4   :  { %389 = vsyncpa [#allocation3 + $0x1], 1 }

</bundles_post_ra>
